<compile_context>
chip_gen: v7x
topology: tpu7x:2x2x1
jax: 0.10.0
libtpu: 0.0.40
codegen_flags: <defaults>
</compile_context>

<pallas_src>
import functools

import jax
import jax.numpy as jnp
from jax.experimental import pallas as pl
from jax.experimental.pallas import tpu as pltpu


LANES = 512  # lane-dense last dim (multiple of 128)


def _tile_config():
    """Generation-conditional (max_tile_rows, vmem_limit_bytes)."""
    vmem_bytes = None
    try:
        info = pltpu.get_tpu_info()
        vmem_bytes = getattr(info, "vmem_capacity_bytes", None)
    except Exception:
        vmem_bytes = None
    if vmem_bytes is not None and vmem_bytes >= 100 * 1024 * 1024:
        # v5e / v6e (128 MiB VMEM): 8 MiB output tiles, ~48 MiB live with double buffering.
        return 4096, 64 * 1024 * 1024
    # v7x (64 MiB VMEM) or unknown: 4 MiB output tiles, ~24 MiB live.
    return 2048, 32 * 1024 * 1024


def _pdfflow_kernel(params_ref, tx_ref, o_ref, *, n_layers):
    """Fused direct-mode PDFFlow over one (2, tile_rows, LANES) tile.

    params_ref: SMEM flat f32, length 6*(n_layers+1):
        row 0          : [a_1, b_1, c_1, 0, 0, 0]                       (first affine)
        row l (1..n)   : [P_l, Q_l, R_l, S_l, b_{l+1}, c_{l+1}]         (fused nonlin_l + affine_{l+1})
                         with a_{n+1}=1, b_{n+1}=c_{n+1}=0 for the last row.
    tx_ref: VMEM (2, tile_rows, LANES) f32 -- [0]=t, [1]=x
    o_ref : VMEM (tile_rows, LANES) f32
    """
    t = tx_ref[0]
    x = tx_ref[1]

    # First layer's affine map: x = a1*x + (b1*t + c1)
    a0 = params_ref[0]
    b0 = params_ref[1]
    c0 = params_ref[2]
    x = a0 * x + (b0 * t + c0)

    # Fused steps (static unroll, n_layers is small).
    for l in range(1, n_layers + 1):
        off = l * 6
        P = params_ref[off + 0]   # a_{l+1} * (alpha_l^2 + 1)
        Q = params_ref[off + 1]   # a_{l+1} * sign(alpha_l)
        R = params_ref[off + 2]   # alpha_l^2 * (alpha_l^2 + 2)
        S = params_ref[off + 3]   # alpha_l^2 * beta_l^2
        r = jnp.sqrt(R * (x * x) + S)
        if l < n_layers:
            Bn = params_ref[off + 4]  # b_{l+1}
            Cn = params_ref[off + 5]  # c_{l+1}
            x = P * x + Q * r + (Bn * t + Cn)
        else:
            # Last layer: trailing affine is the identity -> skip the (0*t + 0) term.
            x = P * x + Q * r
    o_ref[...] = x


def pdfflow_forward(t_input, a, b, c, alpha, beta):
    """Pallas implementation of PDFFlow.forward (direct mode).

    t_input: (N, 2) float32 -- column 0 is t, column 1 is x (matches the module)
    a, b, c: (n_layers,)    -- InvertibleLinearMap params per layer
    alpha, beta: (n_layers,) -- PDFFlowLayer2 params per layer
    returns: (N,) float32
    """
    t_input = jnp.asarray(t_input, jnp.float32)
    N = t_input.shape[0]

    a = jnp.asarray(a, jnp.float32).reshape(-1)
    b = jnp.asarray(b, jnp.float32).reshape(-1)
    c = jnp.asarray(c, jnp.float32).reshape(-1)
    alpha = jnp.asarray(alpha, jnp.float32).reshape(-1)
    beta = jnp.asarray(beta, jnp.float32).reshape(-1)
    n_layers = a.shape[0]

    # ---- Precompute fused per-layer coefficients (all scalar work stays in the wrapper). ----
    alpha2 = alpha * alpha
    s1 = alpha2 + 1.0
    sgn = jnp.sign(alpha)
    Rc = alpha2 * (alpha2 + 2.0)
    Sc = alpha2 * (beta * beta)
    a_next = jnp.concatenate([a[1:], jnp.ones((1,), jnp.float32)])
    b_next = jnp.concatenate([b[1:], jnp.zeros((1,), jnp.float32)])
    c_next = jnp.concatenate([c[1:], jnp.zeros((1,), jnp.float32)])
    Pc = a_next * s1
    Qc = a_next * sgn
    row0 = jnp.concatenate([a[:1], b[:1], c[:1], jnp.zeros((3,), jnp.float32)])
    fused = jnp.stack([Pc, Qc, Rc, Sc, b_next, c_next], axis=1)       # (n_layers, 6)
    params = jnp.concatenate([row0[None, :], fused], axis=0).reshape(-1)  # ((n_layers+1)*6,)

    # ---- Balanced, generation-aware tiling. ----
    max_tile_rows, vmem_limit = _tile_config()
    rows = max(pl.cdiv(N, LANES), 1)
    grid_r = pl.cdiv(rows, max_tile_rows)
    if rows >= 16:
        grid_r = max(grid_r, 2)          # keep both v7x TensorCores busy
    tile_rows = pl.cdiv(pl.cdiv(rows, grid_r), 8) * 8   # balanced, multiple of 8 sublanes
    grid_r = pl.cdiv(rows, tile_rows)
    rows_total = grid_r * tile_rows
    padded = rows_total * LANES

    # ---- Build the stacked (2, rows_total, LANES) lane-dense slab.  Padding is skipped when
    #      N is already aligned, so no extra HBM pass in the common case. ----
    tx = t_input.T                                       # (2, N): row 0 = t, row 1 = x
    if padded != N:
        tx = jnp.pad(tx, ((0, 0), (0, padded - N)))
    tx_slab = tx.reshape(2, rows_total, LANES)

    kernel = functools.partial(_pdfflow_kernel, n_layers=n_layers)
    y_slab = pl.pallas_call(
        kernel,
        out_shape=jax.ShapeDtypeStruct((rows_total, LANES), jnp.float32),
        grid=(grid_r,),
        in_specs=[
            pl.BlockSpec(memory_space=pltpu.SMEM),                    # flat per-layer params
            pl.BlockSpec((2, tile_rows, LANES), lambda i: (0, i, 0)),  # stacked t/x tile
        ],
        out_specs=pl.BlockSpec((tile_rows, LANES), lambda i: (i, 0)),
        compiler_params=pltpu.CompilerParams(
            dimension_semantics=("parallel",),   # v7x: rows split across both TensorCores
            vmem_limit_bytes=vmem_limit,
        ),
    )(params, tx_slab)

    y = y_slab.reshape(-1)
    if padded != N:
        y = y[:N]                                        # trim only when padding was added
    return y


def _pdfflow_ref(t_input, a, b, c, alpha, beta):
    """Pure-JAX reference, mirroring the PyTorch module exactly."""
    t = t_input[:, 0]
    x = t_input[:, 1]
    for l in range(a.shape[0]):
        x = a[l] * x + (b[l] * t + c[l])
        al, be = alpha[l], beta[l]
        x = (al ** 2 + 1.0) * x + al * jnp.sqrt((al ** 2 + 2.0) * x ** 2 + be ** 2)
    return x


if __name__ == "__main__":
    key = jax.random.PRNGKey(0)
    k_a, k_b, k_c, k_alpha, k_beta, k_t, k_x = jax.random.split(key, 7)

    n_layers = 5
    # Match torch init semantics:
    #   InvertibleLinearMap: a = exp(randn), b = randn, c = randn
    #   PDFFlowLayer2:       beta = rand (uniform [0,1)), alpha = randn
    a = jnp.exp(jax.random.normal(k_a, (n_layers,), jnp.float32))
    b = jax.random.normal(k_b, (n_layers,), jnp.float32)
    c = jax.random.normal(k_c, (n_layers,), jnp.float32)
    alpha = jax.random.normal(k_alpha, (n_layers,), jnp.float32)
    beta = jax.random.uniform(k_beta, (n_layers,), jnp.float32)

    # Small input consistent with PDFFlow.forward: t_input of shape (N, 2).
    N = 256
    t = jax.random.normal(k_t, (N,), jnp.float32)
    xcol = jax.random.normal(k_x, (N,), jnp.float32)
    t_input = jnp.stack([t, xcol], axis=1)

    y = pdfflow_forward(t_input, a, b, c, alpha, beta)
    jax.block_until_ready(y)

    ref = _pdfflow_ref(t_input, a, b, c, alpha, beta)
    assert y.shape == (N,)
    assert jnp.allclose(y, ref, atol=1e-4, rtol=1e-4), float(jnp.max(jnp.abs(y - ref)))

    print("KERNEL_OK")
</pallas_src>

<mosaic_0001>
module attributes {stable_mosaic.version = 11 : i64} {
  func.func @_pdfflow_kernel(%arg0: i32, %arg1: memref<36xf32, #tpu.memory_space<smem>>, %arg2: memref<2x8x512xf32, #tpu.memory_space<vmem>>, %arg3: memref<8x512xf32, #tpu.memory_space<vmem>>) attributes {dimension_semantics = [#tpu.dimension_semantics<parallel>], iteration_bounds = array<i64: 1>, scalar_prefetch = 0 : i64, scratch_operands = 0 : i64, tpu.core_type = #tpu.core_type<tc>, window_params = [{transform_indices = @transform_0, window_bounds = array<i64: 36>}, {transform_indices = @transform_1, window_bounds = array<i64: 2, 8, 512>}, {transform_indices = @transform_2, window_bounds = array<i64: 8, 512>}]} {
    %c0 = arith.constant 0 : index
    %c0_0 = arith.constant 0 : index
    %c0_1 = arith.constant 0 : index
    %0 = vector.load %arg2[%c0, %c0_0, %c0_1] : memref<2x8x512xf32, #tpu.memory_space<vmem>>, vector<1x8x512xf32>
    %1 = vector.shape_cast %0 : vector<1x8x512xf32> to vector<8x512xf32>
    %c1 = arith.constant 1 : index
    %c0_2 = arith.constant 0 : index
    %c0_3 = arith.constant 0 : index
    %2 = vector.load %arg2[%c1, %c0_2, %c0_3] : memref<2x8x512xf32, #tpu.memory_space<vmem>>, vector<1x8x512xf32>
    %3 = vector.shape_cast %2 : vector<1x8x512xf32> to vector<8x512xf32>
    %c0_4 = arith.constant 0 : index
    %4 = memref.load %arg1[%c0_4] : memref<36xf32, #tpu.memory_space<smem>>
    %c1_5 = arith.constant 1 : index
    %5 = memref.load %arg1[%c1_5] : memref<36xf32, #tpu.memory_space<smem>>
    %c2 = arith.constant 2 : index
    %6 = memref.load %arg1[%c2] : memref<36xf32, #tpu.memory_space<smem>>
    %7 = vector.broadcast %4 : f32 to vector<8x512xf32>
    %8 = arith.mulf %7, %3 : vector<8x512xf32>
    %9 = vector.broadcast %5 : f32 to vector<8x512xf32>
    %10 = arith.mulf %9, %1 : vector<8x512xf32>
    %11 = vector.broadcast %6 : f32 to vector<8x512xf32>
    %12 = arith.addf %10, %11 : vector<8x512xf32>
    %13 = arith.addf %8, %12 : vector<8x512xf32>
    %c6 = arith.constant 6 : index
    %14 = memref.load %arg1[%c6] : memref<36xf32, #tpu.memory_space<smem>>
    %c7 = arith.constant 7 : index
    %15 = memref.load %arg1[%c7] : memref<36xf32, #tpu.memory_space<smem>>
    %c8 = arith.constant 8 : index
    %16 = memref.load %arg1[%c8] : memref<36xf32, #tpu.memory_space<smem>>
    %c9 = arith.constant 9 : index
    %17 = memref.load %arg1[%c9] : memref<36xf32, #tpu.memory_space<smem>>
    %18 = arith.mulf %13, %13 : vector<8x512xf32>
    %19 = vector.broadcast %16 : f32 to vector<8x512xf32>
    %20 = arith.mulf %19, %18 : vector<8x512xf32>
    %21 = vector.broadcast %17 : f32 to vector<8x512xf32>
    %22 = arith.addf %20, %21 : vector<8x512xf32>
    %23 = math.sqrt %22 : vector<8x512xf32>
    %c10 = arith.constant 10 : index
    %24 = memref.load %arg1[%c10] : memref<36xf32, #tpu.memory_space<smem>>
    %c11 = arith.constant 11 : index
    %25 = memref.load %arg1[%c11] : memref<36xf32, #tpu.memory_space<smem>>
    %26 = vector.broadcast %14 : f32 to vector<8x512xf32>
    %27 = arith.mulf %26, %13 : vector<8x512xf32>
    %28 = vector.broadcast %15 : f32 to vector<8x512xf32>
    %29 = arith.mulf %28, %23 : vector<8x512xf32>
    %30 = arith.addf %27, %29 : vector<8x512xf32>
    %31 = vector.broadcast %24 : f32 to vector<8x512xf32>
    %32 = arith.mulf %31, %1 : vector<8x512xf32>
    %33 = vector.broadcast %25 : f32 to vector<8x512xf32>
    %34 = arith.addf %32, %33 : vector<8x512xf32>
    %35 = arith.addf %30, %34 : vector<8x512xf32>
    %c12 = arith.constant 12 : index
    %36 = memref.load %arg1[%c12] : memref<36xf32, #tpu.memory_space<smem>>
    %c13 = arith.constant 13 : index
    %37 = memref.load %arg1[%c13] : memref<36xf32, #tpu.memory_space<smem>>
    %c14 = arith.constant 14 : index
    %38 = memref.load %arg1[%c14] : memref<36xf32, #tpu.memory_space<smem>>
    %c15 = arith.constant 15 : index
    %39 = memref.load %arg1[%c15] : memref<36xf32, #tpu.memory_space<smem>>
    %40 = arith.mulf %35, %35 : vector<8x512xf32>
    %41 = vector.broadcast %38 : f32 to vector<8x512xf32>
    %42 = arith.mulf %41, %40 : vector<8x512xf32>
    %43 = vector.broadcast %39 : f32 to vector<8x512xf32>
    %44 = arith.addf %42, %43 : vector<8x512xf32>
    %45 = math.sqrt %44 : vector<8x512xf32>
    %c16 = arith.constant 16 : index
    %46 = memref.load %arg1[%c16] : memref<36xf32, #tpu.memory_space<smem>>
    %c17 = arith.constant 17 : index
    %47 = memref.load %arg1[%c17] : memref<36xf32, #tpu.memory_space<smem>>
    %48 = vector.broadcast %36 : f32 to vector<8x512xf32>
    %49 = arith.mulf %48, %35 : vector<8x512xf32>
    %50 = vector.broadcast %37 : f32 to vector<8x512xf32>
    %51 = arith.mulf %50, %45 : vector<8x512xf32>
    %52 = arith.addf %49, %51 : vector<8x512xf32>
    %53 = vector.broadcast %46 : f32 to vector<8x512xf32>
    %54 = arith.mulf %53, %1 : vector<8x512xf32>
    %55 = vector.broadcast %47 : f32 to vector<8x512xf32>
    %56 = arith.addf %54, %55 : vector<8x512xf32>
    %57 = arith.addf %52, %56 : vector<8x512xf32>
    %c18 = arith.constant 18 : index
    %58 = memref.load %arg1[%c18] : memref<36xf32, #tpu.memory_space<smem>>
    %c19 = arith.constant 19 : index
    %59 = memref.load %arg1[%c19] : memref<36xf32, #tpu.memory_space<smem>>
    %c20 = arith.constant 20 : index
    %60 = memref.load %arg1[%c20] : memref<36xf32, #tpu.memory_space<smem>>
    %c21 = arith.constant 21 : index
    %61 = memref.load %arg1[%c21] : memref<36xf32, #tpu.memory_space<smem>>
    %62 = arith.mulf %57, %57 : vector<8x512xf32>
    %63 = vector.broadcast %60 : f32 to vector<8x512xf32>
    %64 = arith.mulf %63, %62 : vector<8x512xf32>
    %65 = vector.broadcast %61 : f32 to vector<8x512xf32>
    %66 = arith.addf %64, %65 : vector<8x512xf32>
    %67 = math.sqrt %66 : vector<8x512xf32>
    %c22 = arith.constant 22 : index
    %68 = memref.load %arg1[%c22] : memref<36xf32, #tpu.memory_space<smem>>
    %c23 = arith.constant 23 : index
    %69 = memref.load %arg1[%c23] : memref<36xf32, #tpu.memory_space<smem>>
    %70 = vector.broadcast %58 : f32 to vector<8x512xf32>
    %71 = arith.mulf %70, %57 : vector<8x512xf32>
    %72 = vector.broadcast %59 : f32 to vector<8x512xf32>
    %73 = arith.mulf %72, %67 : vector<8x512xf32>
    %74 = arith.addf %71, %73 : vector<8x512xf32>
    %75 = vector.broadcast %68 : f32 to vector<8x512xf32>
    %76 = arith.mulf %75, %1 : vector<8x512xf32>
    %77 = vector.broadcast %69 : f32 to vector<8x512xf32>
    %78 = arith.addf %76, %77 : vector<8x512xf32>
    %79 = arith.addf %74, %78 : vector<8x512xf32>
    %c24 = arith.constant 24 : index
    %80 = memref.load %arg1[%c24] : memref<36xf32, #tpu.memory_space<smem>>
    %c25 = arith.constant 25 : index
    %81 = memref.load %arg1[%c25] : memref<36xf32, #tpu.memory_space<smem>>
    %c26 = arith.constant 26 : index
    %82 = memref.load %arg1[%c26] : memref<36xf32, #tpu.memory_space<smem>>
    %c27 = arith.constant 27 : index
    %83 = memref.load %arg1[%c27] : memref<36xf32, #tpu.memory_space<smem>>
    %84 = arith.mulf %79, %79 : vector<8x512xf32>
    %85 = vector.broadcast %82 : f32 to vector<8x512xf32>
    %86 = arith.mulf %85, %84 : vector<8x512xf32>
    %87 = vector.broadcast %83 : f32 to vector<8x512xf32>
    %88 = arith.addf %86, %87 : vector<8x512xf32>
    %89 = math.sqrt %88 : vector<8x512xf32>
    %c28 = arith.constant 28 : index
    %90 = memref.load %arg1[%c28] : memref<36xf32, #tpu.memory_space<smem>>
    %c29 = arith.constant 29 : index
    %91 = memref.load %arg1[%c29] : memref<36xf32, #tpu.memory_space<smem>>
    %92 = vector.broadcast %80 : f32 to vector<8x512xf32>
    %93 = arith.mulf %92, %79 : vector<8x512xf32>
    %94 = vector.broadcast %81 : f32 to vector<8x512xf32>
    %95 = arith.mulf %94, %89 : vector<8x512xf32>
    %96 = arith.addf %93, %95 : vector<8x512xf32>
    %97 = vector.broadcast %90 : f32 to vector<8x512xf32>
    %98 = arith.mulf %97, %1 : vector<8x512xf32>
    %99 = vector.broadcast %91 : f32 to vector<8x512xf32>
    %100 = arith.addf %98, %99 : vector<8x512xf32>
    %101 = arith.addf %96, %100 : vector<8x512xf32>
    %c30 = arith.constant 30 : index
    %102 = memref.load %arg1[%c30] : memref<36xf32, #tpu.memory_space<smem>>
    %c31 = arith.constant 31 : index
    %103 = memref.load %arg1[%c31] : memref<36xf32, #tpu.memory_space<smem>>
    %c32 = arith.constant 32 : index
    %104 = memref.load %arg1[%c32] : memref<36xf32, #tpu.memory_space<smem>>
    %c33 = arith.constant 33 : index
    %105 = memref.load %arg1[%c33] : memref<36xf32, #tpu.memory_space<smem>>
    %106 = arith.mulf %101, %101 : vector<8x512xf32>
    %107 = vector.broadcast %104 : f32 to vector<8x512xf32>
    %108 = arith.mulf %107, %106 : vector<8x512xf32>
    %109 = vector.broadcast %105 : f32 to vector<8x512xf32>
    %110 = arith.addf %108, %109 : vector<8x512xf32>
    %111 = math.sqrt %110 : vector<8x512xf32>
    %112 = vector.broadcast %102 : f32 to vector<8x512xf32>
    %113 = arith.mulf %112, %101 : vector<8x512xf32>
    %114 = vector.broadcast %103 : f32 to vector<8x512xf32>
    %115 = arith.mulf %114, %111 : vector<8x512xf32>
    %116 = arith.addf %113, %115 : vector<8x512xf32>
    %c0_6 = arith.constant 0 : index
    %c0_7 = arith.constant 0 : index
    %117 = vector.load %arg3[%c0_6, %c0_7] : memref<8x512xf32, #tpu.memory_space<vmem>>, vector<8x512xf32>
    tpu.vector_store %arg3[%c0_6, %c0_7], %116 {strides = array<i32>} : memref<8x512xf32, #tpu.memory_space<vmem>>, vector<8x512xf32>,
    return
  }
  func.func @transform_0(%arg0: i32) -> i32 {
    %c0_i32 = arith.constant 0 : i32
    %c0_i32_0 = arith.constant 0 : i32
    return %c0_i32 : i32
  }
  func.func @transform_1(%arg0: i32) -> (i32, i32, i32) {
    %c0_i32 = arith.constant 0 : i32
    %c0_i32_0 = arith.constant 0 : i32
    %c0_i32_1 = arith.constant 0 : i32
    return %c0_i32, %arg0, %c0_i32_0 : i32, i32, i32
  }
  func.func @transform_2(%arg0: i32) -> (i32, i32) {
    %c0_i32 = arith.constant 0 : i32
    %c0_i32_0 = arith.constant 0 : i32
    return %arg0, %c0_i32 : i32, i32
  }
}

</mosaic_0001>

<bundles_post_ra>
// kernel: tpu_custom_call.1
= control target key start
LH: loop header
LB: loop body
LE: loop exit
PB: predicated region body
PF: predicated region fallthrough
CT: control target
= control target key end

     0   :  { %7 = vsyncpa [#allocation5], 0  ;;  %s719_s0 = inlined_call_operand.hbm [shape: f32[36], index: 0, kind: input, shape index: {}]   ;;  %s720_s1 = inlined_call_operand.hbm [shape: f32[2,8,512], index: 1, kind: input, shape index: {}]   ;;  %s721_s2 = inlined_call_operand.hbm [shape: f32[8,512], index: 2, kind: output, shape index: {}]  }
   0x1   :  { %8 = vsyncpa [#allocation3], 0 }
   0x2   :  { %9 = vsyncpa [#allocation4], 0  ;;  %s527_s11 = scalar_lea.hbm %s719_s0, 16 }
   0x3   :  { %p528_p0 = scmp.ne.s32.totalorder %s719_s0, %s527_s11  ;;  %p531_p1 = scmp.lt.u32.totalorder %s527_s11, %s719_s0 }
   0x5   :  { %p533_p2 = pnand %p531_p1, %p528_p0 }
   0x7   :  { %536 = shalt.err (!%p533_p2)
}
   0x8   :  { %s587_s16 = smov [#allocation2]   ;;  %s588_s19 = smov [#allocation6]  }
   0x9   :  { %17 = dma.hbm_to_smem %s719_s0, 16, %s587_s16, [#allocation5]  }
   0xa   :  { %s23_s20 = sshll.u32 %s588_s19, 4  ;;  %s537_s23 = scalar_lea.hbm %s720_s1, 1024  ;;  %s24_s20 = int_to_ptr.vmem [resolvable:$true] %s23_s20 }
   0xb   :  { %p538_p3 = scmp.ne.s32.totalorder %s720_s1, %s537_s23  ;;  %p541_p4 = scmp.lt.u32.totalorder %s537_s23, %s720_s1 }
   0xd   :  { %p543_p5 = pnand %p541_p4, %p538_p3 }
   0xf   :  { %546 = shalt.err (!%p543_p5)
}
  0x10   :  { %s547_s28 = scalar_lea.vmem %s24_s20, 1024  ;;  %p552_p7 = scmp.lt.s32.totalorder %s24_s20, %s24_s20 }
  0x11   :  { %p548_p6 = scmp.ne.s32.totalorder %s24_s20, %s547_s28  ;;  %p553_p8 = scmp.lt.s32.totalorder %s547_s28, %s547_s28 }
  0x13   :  { %p554_p9 = por %p553_p8, %p552_p7 }
  0x15   :  { %p555_p10 = pnand %p554_p9, %p548_p6 }
  0x17   :  { %558 = shalt.err (!%p555_p10)
}
  0x18   :  { %s589_s0 = smov 512   ;;  %s590_s29 = smov 32  }
  0x19   :  { %29 = dma.hbm_to_vmem [thread:$0]  %s720_s1, 1024, %s24_s20, [#allocation3], %s589_s0, %s589_s0, %s590_s29  }
  0x1a   :  { %581 = dma.done.wait [#allocation5], 16  }
  0x1b   :  { %582 = vsyncadd [#allocation5], 4294967280 }
  0x1c   :  { %583 = dma.done.wait [#allocation3], 1024  }
  0x1d   :  { %584 = vsyncadd [#allocation3], 4294966272 }
  0x1e   :  { %36 = sfence }
  0x1f   :  { %s46_s4 = sld [smem:[#allocation2]]  ;;  %s452_s5 = sld [smem:[#allocation2 + $0x1]]  ;;  %v42_v0 = vld [vmem:[#allocation6 + $0x20] sm:$0xff]  ;;  %v43_v1 = vld [vmem:[#allocation6 + $0x28] sm:$0xff]  ;;  %v44_v3 = vld [vmem:[#allocation6 + $0x30] sm:$0xff] }
  0x20   :  { %s453_s6 = sld [smem:[#allocation2 + $0x2]]  ;;  %v631_v2 = vld [vmem:[#allocation6] sm:$0xff]  ;;  %v45_v4 = vld [vmem:[#allocation6 + $0x38] sm:$0xff]  ;;  %v633_v5 = vld [vmem:[#allocation6 + $0x8] sm:$0xff]  ;;  %s456_s1 = sld [smem:[#allocation2 + $0x8]] }
  0x21   :  { %v635_v6 = vld [vmem:[#allocation6 + $0x10] sm:$0xff]  ;;  %v637_v7 = vld [vmem:[#allocation6 + $0x18] sm:$0xff]  ;;  %s457_s7 = sld [smem:[#allocation2 + $0x9]]  ;;  %s458_s8 = sld [smem:[#allocation2 + $0xa]] }
  0x22   :  { %s454_s9 = sld [smem:[#allocation2 + $0x6]]  ;;  %s455_s10 = sld [smem:[#allocation2 + $0x7]] }
  0x23   :  { %s459_s11 = sld [smem:[#allocation2 + $0xb]]  ;;  %s462_s12 = sld [smem:[#allocation2 + $0xe]] }
  0x24   :  { %s463_s13 = sld [smem:[#allocation2 + $0xf]]  ;;  %s464_s14 = sld [smem:[#allocation2 + $0x10]] }
  0x25   :  { %v49_v8 = vstv %s46_s4  ;;  %v54_v13 = vstv %s452_s5  ;;  %s460_s15 = sld [smem:[#allocation2 + $0xc]]  ;;  %s465_s16 = sld [smem:[#allocation2 + $0x11]] }
  0x26   :  { %v50_v9 = vmul.f32 %v49_v8, %v42_v0  ;;  %v51_v10 = vmul.f32 %v49_v8, %v43_v1  ;;  %v52_v11 = vmul.f32 %v49_v8, %v44_v3  ;;  %v53_v12 = vmul.f32 %v49_v8, %v45_v4  ;;  %s461_s17 = sld [smem:[#allocation2 + $0xd]]  ;;  %s468_s18 = sld [smem:[#allocation2 + $0x14]] }
  0x27   :  { %v59_v14 = vstv %s453_s6  ;;  %v55_v15 = vmul.f32 %v54_v13, %v631_v2  ;;  %v56_v16 = vmul.f32 %v54_v13, %v633_v5  ;;  %v57_v17 = vmul.f32 %v54_v13, %v635_v6  ;;  %s469_s19 = sld [smem:[#allocation2 + $0x15]]  ;;  %s470_s20 = sld [smem:[#allocation2 + $0x16]] }
  0x28   :  { %v58_v18 = vmul.f32 %v54_v13, %v637_v7  ;;  %v76_v27 = vstv %s456_s1  ;;  %v81_v32 = vstv %s457_s7  ;;  %v130_v41 = vstv %s458_s8  ;;  %s466_s21 = sld [smem:[#allocation2 + $0x12]]  ;;  %s471_s22 = sld [smem:[#allocation2 + $0x17]] }
  0x29   :  { %v60_v19 = vadd.f32 %v59_v14, %v55_v15  ;;  %v61_v20 = vadd.f32 %v59_v14, %v56_v16  ;;  %v62_v21 = vadd.f32 %v59_v14, %v57_v17  ;;  %v116_v42 = vstv %s454_s9  ;;  %s467_s23 = sld [smem:[#allocation2 + $0x13]]  ;;  %s474_s24 = sld [smem:[#allocation2 + $0x1a]] }
  0x2a   :  { %v63_v22 = vadd.f32 %v59_v14, %v58_v18  ;;  %v121_v43 = vstv %s455_s10  ;;  %v131_v44 = vmul.f32 %v130_v41, %v631_v2  ;;  %v132_v45 = vmul.f32 %v130_v41, %v633_v5  ;;  %s475_s25 = sld [smem:[#allocation2 + $0x1b]]  ;;  %s476_s26 = sld [smem:[#allocation2 + $0x1c]] }
  0x2b   :  { %v64_v23 = vadd.f32 %v60_v19, %v50_v9  ;;  %v65_v24 = vadd.f32 %v61_v20, %v51_v10  ;;  %v66_v25 = vadd.f32 %v62_v21, %v52_v11  ;;  %v133_v46 = vmul.f32 %v130_v41, %v635_v6  ;;  %s472_s27 = sld [smem:[#allocation2 + $0x18]]  ;;  %s477_s28 = sld [smem:[#allocation2 + $0x1d]] }
  0x2c   :  { %v67_v26 = vadd.f32 %v63_v22, %v53_v12  ;;  %v134_v47 = vmul.f32 %v130_v41, %v637_v7  ;;  %v135_v51 = vstv %s459_s11  ;;  %s473_s0 = sld [smem:[#allocation2 + $0x19]]  ;;  %s480_s29 = sld [smem:[#allocation2 + $0x20]] }
  0x2d   :  { %v72_v28 = vmul.f32 %v64_v23, %v64_v23  ;;  %v73_v29 = vmul.f32 %v65_v24, %v65_v24  ;;  %v74_v30 = vmul.f32 %v66_v25, %v66_v25  ;;  %v117_v48 = vmul.f32 %v116_v42, %v64_v23  ;;  %s481_s30 = sld [smem:[#allocation2 + $0x21]]  ;;  %s478_s3 = sld [smem:[#allocation2 + $0x1e]] }
  0x2e   :  { %v75_v31 = vmul.f32 %v67_v26, %v67_v26  ;;  %v118_v49 = vmul.f32 %v116_v42, %v65_v24  ;;  %v119_v50 = vmul.f32 %v116_v42, %v66_v25  ;;  %v120_v54 = vmul.f32 %v116_v42, %v67_v26  ;;  %s479_s4 = sld [smem:[#allocation2 + $0x1f]]  ;;  %s591_s5 = smov [#allocation7]  }
  0x2f   :  { %v77_v33 = vmul.f32 %v76_v27, %v72_v28  ;;  %v78_v34 = vmul.f32 %v76_v27, %v73_v29  ;;  %v79_v35 = vmul.f32 %v76_v27, %v74_v30  ;;  %v136_v11 = vadd.f32 %v135_v51, %v131_v44  ;;  %s442_s6 = sshll.u32 %s591_s5, 4  ;;  %s443_s6 = int_to_ptr.vmem [resolvable:$true] %s442_s6 }
  0x30   :  { %v80_v36 = vmul.f32 %v76_v27, %v75_v31  ;;  %v137_v15 = vadd.f32 %v135_v51, %v132_v45  ;;  %v138_v19 = vadd.f32 %v135_v51, %v133_v46  ;;  %v139_v22 = vadd.f32 %v135_v51, %v134_v47  ;;  %s559_s1 = scalar_lea.vmem %s443_s6, 512  ;;  %p564_p12 = scmp.lt.s32.totalorder %s443_s6, %s443_s6 }
  0x31   :  { %v82_v37 = vadd.f32 %v81_v32, %v77_v33  ;;  %v83_v38 = vadd.f32 %v81_v32, %v78_v34  ;;  %v84_v39 = vadd.f32 %v81_v32, %v79_v35  ;;  %v152_v27 = vstv %s462_s12  ;;  %p560_p11 = scmp.ne.s32.totalorder %s443_s6, %s559_s1  ;;  %p565_p13 = scmp.lt.s32.totalorder %s559_s1, %s559_s1 }
  0x32   :  { %v85_v40 = vadd.f32 %v81_v32, %v80_v36  ;;  %v157_v32 = vstv %s463_s13  ;;  %v192_v46 = vstv %s460_s15  ;;  %v211_v47 = vstv %s465_s16 }
  0x33   :  { %487 = vrsqrt.f32 %v82_v37  ;;  %vm88_vm0 = vcmp.eq.f32.partialorder %v82_v37, inf  ;;  %vm90_vm1 = vcmp.eq.f32.partialorder %v82_v37, 0.0  ;;  %v91_v53 = vand.u32 2147483648, %v82_v37  ;;  %p566_p0 = por %p565_p13, %p564_p12 }
  0x34   :  { %489 = vrsqrt.f32 %v83_v38  ;;  %vm95_vm2 = vcmp.eq.f32.partialorder %v83_v38, inf  ;;  %vm97_vm3 = vcmp.eq.f32.partialorder %v83_v38, 0.0  ;;  %v98_v57 = vand.u32 2147483648, %v83_v38 }
  0x35   :  { %491 = vrsqrt.f32 %v84_v39  ;;  %vm102_vm4 = vcmp.eq.f32.partialorder %v84_v39, inf  ;;  %vm104_vm5 = vcmp.eq.f32.partialorder %v84_v39, 0.0  ;;  %v105_v60 = vand.u32 2147483648, %v84_v39  ;;  %p567_p1 = pnand %p566_p0, %p560_p11 }
  0x36   :  { %493 = vrsqrt.f32 %v85_v40  ;;  %vm109_vm6 = vcmp.eq.f32.partialorder %v85_v40, inf  ;;  %v112_v0 = vand.u32 2147483648, %v85_v40  ;;  %vm111_vm7 = vcmp.eq.f32.partialorder %v85_v40, 0.0 }
  0x3d   :  { %v488_v52 = vpop.eup %487 }
  0x3e   :  { %v490_v55 = vpop.eup %489  ;;  %v87_v56 = vmul.f32 %v488_v52, %v82_v37 }
  0x3f   :  { %v492_v58 = vpop.eup %491  ;;  %v94_v59 = vmul.f32 %v490_v55, %v83_v38 }
  0x40   :  { %v494_v61 = vpop.eup %493  ;;  %v89_v62 = vsel %vm88_vm0, %v82_v37, %v87_v56  ;;  %v101_v63 = vmul.f32 %v492_v58, %v84_v39 }
  0x41   :  { %v92_v1 = vsel %vm90_vm1, %v91_v53, %v89_v62  ;;  %v96_v3 = vsel %vm95_vm2, %v83_v38, %v94_v59  ;;  %v108_v4 = vmul.f32 %v494_v61, %v85_v40 }
  0x42   :  { %v99_v8 = vsel %vm97_vm3, %v98_v57, %v96_v3  ;;  %v103_v9 = vsel %vm102_vm4, %v84_v39, %v101_v63  ;;  %v122_v10 = vmul.f32 %v121_v43, %v92_v1 }
  0x43   :  { %v106_v12 = vsel %vm104_vm5, %v105_v60, %v103_v9  ;;  %v110_v13 = vsel %vm109_vm6, %v85_v40, %v108_v4  ;;  %v123_v14 = vmul.f32 %v121_v43, %v99_v8 }
  0x44   :  { %v113_v16 = vsel %vm111_vm7, %v112_v0, %v110_v13  ;;  %v124_v17 = vmul.f32 %v121_v43, %v106_v12  ;;  %v126_v18 = vadd.f32 %v122_v10, %v117_v48  ;;  %v197_v48 = vstv %s461_s17 }
  0x45   :  { %v125_v20 = vmul.f32 %v121_v43, %v113_v16  ;;  %v127_v21 = vadd.f32 %v123_v14, %v118_v49  ;;  %v206_v43 = vstv %s464_s14 }
  0x46   :  { %v128_v23 = vadd.f32 %v124_v17, %v119_v50  ;;  %v140_v24 = vadd.f32 %v136_v11, %v126_v18  ;;  %v207_v44 = vmul.f32 %v206_v43, %v631_v2  ;;  %v208_v45 = vmul.f32 %v206_v43, %v633_v5 }
  0x47   :  { %v129_v25 = vadd.f32 %v125_v20, %v120_v54  ;;  %v141_v26 = vadd.f32 %v137_v15, %v127_v21  ;;  %v209_v49 = vmul.f32 %v206_v43, %v635_v6  ;;  %v210_v51 = vmul.f32 %v206_v43, %v637_v7 }
  0x48   :  { %v651_v28 = vadd.f32 %v138_v19, %v128_v23  ;;  %v148_v29 = vmul.f32 %v140_v24, %v140_v24  ;;  %v193_v50 = vmul.f32 %v192_v46, %v140_v24  ;;  %v212_v52 = vadd.f32 %v211_v47, %v207_v44 }
  0x49   :  { %v653_v30 = vadd.f32 %v139_v22, %v129_v25  ;;  %v149_v31 = vmul.f32 %v141_v26, %v141_v26  ;;  %v213_v53 = vadd.f32 %v211_v47, %v208_v45  ;;  %v194_v56 = vmul.f32 %v192_v46, %v141_v26 }
  0x4a   :  { %v150_v33 = vmul.f32 %v651_v28, %v651_v28  ;;  %v153_v34 = vmul.f32 %v152_v27, %v148_v29  ;;  %v195_v12 = vmul.f32 %v192_v46, %v651_v28  ;;  %v214_v21 = vadd.f32 %v211_v47, %v209_v49 }
  0x4b   :  { %v151_v35 = vmul.f32 %v653_v30, %v653_v30  ;;  %v154_v36 = vmul.f32 %v152_v27, %v149_v31  ;;  %v196_v16 = vmul.f32 %v192_v46, %v653_v30  ;;  %v215_v24 = vadd.f32 %v211_v47, %v210_v51 }
  0x4c   :  { %v155_v37 = vmul.f32 %v152_v27, %v150_v33  ;;  %v158_v38 = vadd.f32 %v157_v32, %v153_v34  ;;  %v228_v31 = vstv %s468_s18  ;;  %v233_v34 = vstv %s469_s19 }
  0x4d   :  { %v156_v39 = vmul.f32 %v152_v27, %v151_v35  ;;  %v159_v40 = vadd.f32 %v157_v32, %v154_v36  ;;  %v282_v45 = vstv %s470_s20  ;;  %v287_v49 = vstv %s471_s22 }
  0x4e   :  { %v160_v41 = vadd.f32 %v157_v32, %v155_v37  ;;  %495 = vrsqrt.f32 %v158_v38  ;;  %vm164_vm8 = vcmp.eq.f32.partialorder %v158_v38, inf  ;;  %vm166_vm9 = vcmp.eq.f32.partialorder %v158_v38, 0.0 }
  0x4f   :  { %v161_v42 = vadd.f32 %v157_v32, %v156_v39  ;;  %497 = vrsqrt.f32 %v159_v40  ;;  %v167_v55 = vand.u32 2147483648, %v158_v38  ;;  %vm171_vm10 = vcmp.eq.f32.partialorder %v159_v40, inf }
  0x50   :  { %499 = vrsqrt.f32 %v160_v41  ;;  %vm173_vm11 = vcmp.eq.f32.partialorder %v159_v40, 0.0  ;;  %v174_v59 = vand.u32 2147483648, %v159_v40  ;;  %vm178_vm12 = vcmp.eq.f32.partialorder %v160_v41, inf }
  0x51   :  { %501 = vrsqrt.f32 %v161_v42  ;;  %vm180_vm13 = vcmp.eq.f32.partialorder %v160_v41, 0.0  ;;  %v181_v62 = vand.u32 2147483648, %v160_v41  ;;  %vm185_vm14 = vcmp.eq.f32.partialorder %v161_v42, inf }
  0x52   :  { %v188_v3 = vand.u32 2147483648, %v161_v42  ;;  %vm187_vm15 = vcmp.eq.f32.partialorder %v161_v42, 0.0  ;;  %v283_v46 = vmul.f32 %v282_v45, %v631_v2  ;;  %v284_v47 = vmul.f32 %v282_v45, %v633_v5 }
  0x53   :  { %v285_v51 = vmul.f32 %v282_v45, %v635_v6 }
  0x58   :  { %v496_v54 = vpop.eup %495 }
  0x59   :  { %v498_v57 = vpop.eup %497  ;;  %v163_v58 = vmul.f32 %v496_v54, %v158_v38  ;;  %v288_v54 = vadd.f32 %v287_v49, %v283_v46 }
  0x5a   :  { %v500_v60 = vpop.eup %499  ;;  %v170_v61 = vmul.f32 %v498_v57, %v159_v40 }
  0x5b   :  { %v502_v63 = vpop.eup %501  ;;  %v165_v0 = vsel %vm164_vm8, %v158_v38, %v163_v58  ;;  %v177_v1 = vmul.f32 %v500_v60, %v160_v41 }
  0x5c   :  { %v168_v4 = vsel %vm166_vm9, %v167_v55, %v165_v0  ;;  %v172_v8 = vsel %vm171_vm10, %v159_v40, %v170_v61  ;;  %v184_v9 = vmul.f32 %v502_v63, %v161_v42  ;;  %v289_v55 = vadd.f32 %v287_v49, %v284_v47 }
  0x5d   :  { %v175_v10 = vsel %vm173_vm11, %v174_v59, %v172_v8  ;;  %v179_v11 = vsel %vm178_vm12, %v160_v41, %v177_v1  ;;  %v198_v13 = vmul.f32 %v197_v48, %v168_v4  ;;  %v358_v47 = vstv %s476_s26 }
  0x5e   :  { %v182_v14 = vsel %vm180_vm13, %v181_v62, %v179_v11  ;;  %v186_v15 = vsel %vm185_vm14, %v161_v42, %v184_v9  ;;  %v199_v17 = vmul.f32 %v197_v48, %v175_v10 }
  0x5f   :  { %v189_v18 = vsel %vm187_vm15, %v188_v3, %v186_v15  ;;  %v200_v19 = vmul.f32 %v197_v48, %v182_v14  ;;  %v202_v20 = vadd.f32 %v198_v13, %v193_v50  ;;  %v273_v50 = vstv %s467_s23 }
  0x60   :  { %v201_v22 = vmul.f32 %v197_v48, %v189_v18  ;;  %v203_v23 = vadd.f32 %v199_v17, %v194_v56  ;;  %v268_v48 = vstv %s466_s21 }
  0x61   :  { %v204_v25 = vadd.f32 %v200_v19, %v195_v12  ;;  %v216_v26 = vadd.f32 %v212_v52, %v202_v20 }
  0x62   :  { %v205_v27 = vadd.f32 %v201_v22, %v196_v16  ;;  %v217_v29 = vadd.f32 %v213_v53, %v203_v23  ;;  %v286_v53 = vmul.f32 %v282_v45, %v637_v7  ;;  %v290_v23 = vadd.f32 %v287_v49, %v285_v51 }
  0x63   :  { %v669_v28 = vadd.f32 %v214_v21, %v204_v25  ;;  %v224_v32 = vmul.f32 %v216_v26, %v216_v26  ;;  %v269_v52 = vmul.f32 %v268_v48, %v216_v26  ;;  %v363_v51 = vstv %s477_s28 }
  0x64   :  { %v671_v33 = vadd.f32 %v215_v24, %v205_v27  ;;  %v225_v30 = vmul.f32 %v217_v29, %v217_v29  ;;  %v270_v58 = vmul.f32 %v268_v48, %v217_v29  ;;  %v291_v26 = vadd.f32 %v287_v49, %v286_v53 }
  0x65   :  { %v226_v35 = vmul.f32 %v669_v28, %v669_v28  ;;  %v229_v36 = vmul.f32 %v228_v31, %v224_v32  ;;  %v271_v14 = vmul.f32 %v268_v48, %v669_v28  ;;  %v360_v49 = vmul.f32 %v358_v47, %v633_v5 }
  0x66   :  { %v227_v37 = vmul.f32 %v671_v33, %v671_v33  ;;  %v230_v38 = vmul.f32 %v228_v31, %v225_v30  ;;  %v272_v18 = vmul.f32 %v268_v48, %v671_v33  ;;  %v304_v30 = vstv %s474_s24 }
  0x67   :  { %v231_v39 = vmul.f32 %v228_v31, %v226_v35  ;;  %v234_v40 = vadd.f32 %v233_v34, %v229_v36  ;;  %v309_v36 = vstv %s475_s25  ;;  %v359_v48 = vmul.f32 %v358_v47, %v631_v2 }
  0x68   :  { %v232_v41 = vmul.f32 %v228_v31, %v227_v37  ;;  %v235_v42 = vadd.f32 %v233_v34, %v230_v38  ;;  %v361_v53 = vmul.f32 %v358_v47, %v635_v6 }
  0x69   :  { %v236_v43 = vadd.f32 %v233_v34, %v231_v39  ;;  %503 = vrsqrt.f32 %v234_v40  ;;  %vm240_vm0 = vcmp.eq.f32.partialorder %v234_v40, inf  ;;  %vm242_vm1 = vcmp.eq.f32.partialorder %v234_v40, 0.0 }
  0x6a   :  { %v237_v44 = vadd.f32 %v233_v34, %v232_v41  ;;  %505 = vrsqrt.f32 %v235_v42  ;;  %v243_v57 = vand.u32 2147483648, %v234_v40  ;;  %vm247_vm2 = vcmp.eq.f32.partialorder %v235_v42, inf }
  0x6b   :  { %507 = vrsqrt.f32 %v236_v43  ;;  %vm249_vm3 = vcmp.eq.f32.partialorder %v235_v42, 0.0  ;;  %v250_v61 = vand.u32 2147483648, %v235_v42  ;;  %vm254_vm4 = vcmp.eq.f32.partialorder %v236_v43, inf }
  0x6c   :  { %509 = vrsqrt.f32 %v237_v44  ;;  %vm256_vm5 = vcmp.eq.f32.partialorder %v236_v43, 0.0  ;;  %v257_v0 = vand.u32 2147483648, %v236_v43  ;;  %vm261_vm6 = vcmp.eq.f32.partialorder %v237_v44, inf }
  0x6d   :  { %v264_v8 = vand.u32 2147483648, %v237_v44  ;;  %vm263_vm7 = vcmp.eq.f32.partialorder %v237_v44, 0.0 }
  0x73   :  { %v504_v56 = vpop.eup %503 }
  0x74   :  { %v506_v59 = vpop.eup %505  ;;  %v239_v60 = vmul.f32 %v504_v56, %v234_v40  ;;  %v364_v56 = vadd.f32 %v363_v51, %v359_v48 }
  0x75   :  { %v508_v62 = vpop.eup %507  ;;  %v246_v63 = vmul.f32 %v506_v59, %v235_v42 }
  0x76   :  { %v510_v1 = vpop.eup %509  ;;  %v241_v3 = vsel %vm240_vm0, %v234_v40, %v239_v60  ;;  %v253_v4 = vmul.f32 %v508_v62, %v236_v43 }
  0x77   :  { %v244_v9 = vsel %vm242_vm1, %v243_v57, %v241_v3  ;;  %v248_v10 = vsel %vm247_vm2, %v235_v42, %v246_v63  ;;  %v260_v11 = vmul.f32 %v510_v1, %v237_v44  ;;  %v365_v57 = vadd.f32 %v363_v51, %v360_v49 }
  0x78   :  { %v251_v12 = vsel %vm249_vm3, %v250_v61, %v248_v10  ;;  %v255_v13 = vsel %vm254_vm4, %v236_v43, %v253_v4  ;;  %v274_v15 = vmul.f32 %v273_v50, %v244_v9 }
  0x79   :  { %v258_v16 = vsel %vm256_vm5, %v257_v0, %v255_v13  ;;  %v262_v17 = vsel %vm261_vm6, %v237_v44, %v260_v11  ;;  %v275_v19 = vmul.f32 %v273_v50, %v251_v12 }
  0x7a   :  { %v265_v20 = vsel %vm263_vm7, %v264_v8, %v262_v17  ;;  %v276_v21 = vmul.f32 %v273_v50, %v258_v16  ;;  %v278_v22 = vadd.f32 %v274_v15, %v269_v52  ;;  %v349_v52 = vstv %s473_s0 }
  0x7b   :  { %v277_v24 = vmul.f32 %v273_v50, %v265_v20  ;;  %v279_v25 = vadd.f32 %v275_v19, %v270_v58  ;;  %v344_v50 = vstv %s472_s27 }
  0x7c   :  { %v280_v27 = vadd.f32 %v276_v21, %v271_v14  ;;  %v292_v29 = vadd.f32 %v288_v54, %v278_v22  ;;  %v366_v21 = vadd.f32 %v363_v51, %v361_v53 }
  0x7d   :  { %v281_v31 = vadd.f32 %v277_v24, %v272_v18  ;;  %v293_v32 = vadd.f32 %v289_v55, %v279_v25  ;;  %v362_v55 = vmul.f32 %v358_v47, %v637_v7  ;;  %v423_v47 = vstv %s479_s4 }
  0x7e   :  { %v687_v28 = vadd.f32 %v290_v23, %v280_v27  ;;  %v300_v34 = vmul.f32 %v292_v29, %v292_v29  ;;  %v345_v54 = vmul.f32 %v344_v50, %v292_v29 }
  0x7f   :  { %v689_v35 = vadd.f32 %v291_v26, %v281_v31  ;;  %v301_v33 = vmul.f32 %v293_v32, %v293_v32  ;;  %v346_v60 = vmul.f32 %v344_v50, %v293_v32  ;;  %v367_v24 = vadd.f32 %v363_v51, %v362_v55 }
  0x80   :  { %v302_v37 = vmul.f32 %v687_v28, %v687_v28  ;;  %v305_v38 = vmul.f32 %v304_v30, %v300_v34  ;;  %v347_v12 = vmul.f32 %v344_v50, %v687_v28  ;;  %v380_v31 = vstv %s480_s29 }
  0x81   :  { %v303_v39 = vmul.f32 %v689_v35, %v689_v35  ;;  %v306_v40 = vmul.f32 %v304_v30, %v301_v33  ;;  %v348_v16 = vmul.f32 %v344_v50, %v689_v35  ;;  %v385_v33 = vstv %s481_s30 }
  0x82   :  { %v307_v41 = vmul.f32 %v304_v30, %v302_v37  ;;  %v310_v42 = vadd.f32 %v309_v36, %v305_v38 }
  0x83   :  { %v308_v43 = vmul.f32 %v304_v30, %v303_v39  ;;  %v311_v44 = vadd.f32 %v309_v36, %v306_v40 }
  0x84   :  { %v312_v45 = vadd.f32 %v309_v36, %v307_v41  ;;  %511 = vrsqrt.f32 %v310_v42  ;;  %vm316_vm8 = vcmp.eq.f32.partialorder %v310_v42, inf  ;;  %vm318_vm9 = vcmp.eq.f32.partialorder %v310_v42, 0.0 }
  0x85   :  { %v313_v46 = vadd.f32 %v309_v36, %v308_v43  ;;  %513 = vrsqrt.f32 %v311_v44  ;;  %v319_v59 = vand.u32 2147483648, %v310_v42  ;;  %vm323_vm10 = vcmp.eq.f32.partialorder %v311_v44, inf }
  0x86   :  { %515 = vrsqrt.f32 %v312_v45  ;;  %vm325_vm11 = vcmp.eq.f32.partialorder %v311_v44, 0.0  ;;  %v326_v2 = vand.u32 2147483648, %v311_v44  ;;  %vm330_vm12 = vcmp.eq.f32.partialorder %v312_v45, inf }
  0x87   :  { %517 = vrsqrt.f32 %v313_v46  ;;  %vm332_vm13 = vcmp.eq.f32.partialorder %v312_v45, 0.0  ;;  %v333_v6 = vand.u32 2147483648, %v312_v45  ;;  %vm337_vm14 = vcmp.eq.f32.partialorder %v313_v46, inf }
  0x88   :  { %v340_v3 = vand.u32 2147483648, %v313_v46  ;;  %vm339_vm15 = vcmp.eq.f32.partialorder %v313_v46, 0.0 }
  0x8e   :  { %v512_v58 = vpop.eup %511 }
  0x8f   :  { %v514_v61 = vpop.eup %513  ;;  %v315_v62 = vmul.f32 %v512_v58, %v310_v42 }
  0x90   :  { %v516_v5 = vpop.eup %515  ;;  %v322_v63 = vmul.f32 %v514_v61, %v311_v44 }
  0x91   :  { %v518_v0 = vpop.eup %517  ;;  %v317_v7 = vsel %vm316_vm8, %v310_v42, %v315_v62  ;;  %v329_v1 = vmul.f32 %v516_v5, %v312_v45 }
  0x92   :  { %v320_v4 = vsel %vm318_vm9, %v319_v59, %v317_v7  ;;  %v324_v8 = vsel %vm323_vm10, %v311_v44, %v322_v63  ;;  %v336_v9 = vmul.f32 %v518_v0, %v313_v46 }
  0x93   :  { %v327_v10 = vsel %vm325_vm11, %v326_v2, %v324_v8  ;;  %v331_v11 = vsel %vm330_vm12, %v312_v45, %v329_v1  ;;  %v350_v13 = vmul.f32 %v349_v52, %v320_v4  ;;  %v418_v45 = vstv %s478_s3 }
  0x94   :  { %v334_v14 = vsel %vm332_vm13, %v333_v6, %v331_v11  ;;  %v338_v15 = vsel %vm337_vm14, %v313_v46, %v336_v9  ;;  %v351_v17 = vmul.f32 %v349_v52, %v327_v10 }
  0x95   :  { %v341_v18 = vsel %vm339_vm15, %v340_v3, %v338_v15  ;;  %v352_v19 = vmul.f32 %v349_v52, %v334_v14  ;;  %v354_v20 = vadd.f32 %v350_v13, %v345_v54 }
  0x96   :  { %v353_v22 = vmul.f32 %v349_v52, %v341_v18  ;;  %v355_v23 = vadd.f32 %v351_v17, %v346_v60 }
  0x97   :  { %v356_v25 = vadd.f32 %v352_v19, %v347_v12  ;;  %v368_v26 = vadd.f32 %v364_v56, %v354_v20 }
  0x98   :  { %v357_v27 = vadd.f32 %v353_v22, %v348_v16  ;;  %v369_v29 = vadd.f32 %v365_v57, %v355_v23 }
  0x99   :  { %v370_v32 = vadd.f32 %v366_v21, %v356_v25  ;;  %v376_v30 = vmul.f32 %v368_v26, %v368_v26  ;;  %v419_v46 = vmul.f32 %v418_v45, %v368_v26 }
  0x9a   :  { %v371_v28 = vadd.f32 %v367_v24, %v357_v27  ;;  %v377_v34 = vmul.f32 %v369_v29, %v369_v29  ;;  %v420_v50 = vmul.f32 %v418_v45, %v369_v29 }
  0x9b   :  { %v378_v36 = vmul.f32 %v370_v32, %v370_v32  ;;  %v381_v35 = vmul.f32 %v380_v31, %v376_v30  ;;  %v421_v6 = vmul.f32 %v418_v45, %v370_v32 }
  0x9c   :  { %v379_v37 = vmul.f32 %v371_v28, %v371_v28  ;;  %v382_v38 = vmul.f32 %v380_v31, %v377_v34  ;;  %v422_v3 = vmul.f32 %v418_v45, %v371_v28 }
  0x9d   :  { %v383_v39 = vmul.f32 %v380_v31, %v378_v36  ;;  %v386_v40 = vadd.f32 %v385_v33, %v381_v35 }
  0x9e   :  { %v384_v41 = vmul.f32 %v380_v31, %v379_v37  ;;  %v387_v42 = vadd.f32 %v385_v33, %v382_v38 }
  0x9f   :  { %v388_v43 = vadd.f32 %v385_v33, %v383_v39  ;;  %519 = vrsqrt.f32 %v386_v40  ;;  %vm392_vm0 = vcmp.eq.f32.partialorder %v386_v40, inf  ;;  %vm394_vm1 = vcmp.eq.f32.partialorder %v386_v40, 0.0 }
  0xa0   :  { %v389_v44 = vadd.f32 %v385_v33, %v384_v41  ;;  %521 = vrsqrt.f32 %v387_v42  ;;  %v395_v49 = vand.u32 2147483648, %v386_v40  ;;  %vm399_vm2 = vcmp.eq.f32.partialorder %v387_v42, inf }
  0xa1   :  { %523 = vrsqrt.f32 %v388_v43  ;;  %vm401_vm3 = vcmp.eq.f32.partialorder %v387_v42, 0.0  ;;  %v402_v53 = vand.u32 2147483648, %v387_v42  ;;  %vm406_vm4 = vcmp.eq.f32.partialorder %v388_v43, inf }
  0xa2   :  { %525 = vrsqrt.f32 %v389_v44  ;;  %vm408_vm5 = vcmp.eq.f32.partialorder %v388_v43, 0.0  ;;  %v409_v56 = vand.u32 2147483648, %v388_v43  ;;  %vm413_vm6 = vcmp.eq.f32.partialorder %v389_v44, inf }
  0xa3   :  { %v416_v60 = vand.u32 2147483648, %v389_v44  ;;  %vm415_vm7 = vcmp.eq.f32.partialorder %v389_v44, 0.0 }
  0xa9   :  { %v520_v48 = vpop.eup %519 }
  0xaa   :  { %v522_v51 = vpop.eup %521  ;;  %v391_v52 = vmul.f32 %v520_v48, %v386_v40 }
  0xab   :  { %v524_v54 = vpop.eup %523  ;;  %v398_v55 = vmul.f32 %v522_v51, %v387_v42 }
  0xac   :  { %v526_v57 = vpop.eup %525  ;;  %v393_v58 = vsel %vm392_vm0, %v386_v40, %v391_v52  ;;  %v405_v59 = vmul.f32 %v524_v54, %v388_v43 }
  0xad   :  { %v396_v61 = vsel %vm394_vm1, %v395_v49, %v393_v58  ;;  %v400_v62 = vsel %vm399_vm2, %v387_v42, %v398_v55  ;;  %v412_v2 = vmul.f32 %v526_v57, %v389_v44 }
  0xae   :  { %v403_v5 = vsel %vm401_vm3, %v402_v53, %v400_v62  ;;  %v407_v63 = vsel %vm406_vm4, %v388_v43, %v405_v59  ;;  %v424_v0 = vmul.f32 %v423_v47, %v396_v61 }
  0xaf   :  { %v410_v7 = vsel %vm408_vm5, %v409_v56, %v407_v63  ;;  %v414_v1 = vsel %vm413_vm6, %v389_v44, %v412_v2  ;;  %v425_v4 = vmul.f32 %v423_v47, %v403_v5 }
  0xb0   :  { %v417_v8 = vsel %vm415_vm7, %v416_v60, %v414_v1  ;;  %v426_v9 = vmul.f32 %v423_v47, %v410_v7  ;;  %v428_v10 = vadd.f32 %v424_v0, %v419_v46 }
  0xb1   :  { %v427_v11 = vmul.f32 %v423_v47, %v417_v8  ;;  %v429_v12 = vadd.f32 %v425_v4, %v420_v50 }
  0xb2   :  { %v430_v13 = vadd.f32 %v426_v9, %v421_v6  ;;  %432 = vst [vmem:[#allocation7] sm:$0xff] %v428_v10 }
  0xb3   :  { %v431_v14 = vadd.f32 %v427_v11, %v422_v3  ;;  %433 = vst [vmem:[#allocation7 + $0x8] sm:$0xff] %v429_v12 }
  0xb4   :  { %434 = vst [vmem:[#allocation7 + $0x10] sm:$0xff] %v430_v13 }
  0xb5   :  { %435 = vst [vmem:[#allocation7 + $0x18] sm:$0xff] %v431_v14 }
  0xb6   :  { %570 = shalt.err (!%p567_p1)
}
  0xb7   :  { %s571_s9 = scalar_lea.hbm %s721_s2, 512 }
  0xb8   :  { %p572_p2 = scmp.ne.s32.totalorder %s721_s2, %s571_s9  ;;  %p575_p3 = scmp.lt.u32.totalorder %s571_s9, %s721_s2 }
  0xba   :  { %p577_p4 = pnand %p575_p3, %p572_p2 }
  0xbc   :  { %580 = shalt.err (!%p577_p4)
}
  0xbd   :  { %445 = dma.vmem_to_hbm [thread:$0]  %s443_s6, 512, %s721_s2, [#allocation4]  }
  0xbe   :  { %585 = dma.done.wait [#allocation4], 512  }
  0xbf   :  { %586 = vsyncadd [#allocation4], 4294966784 }
  0xc0   :  { %449 = vsyncpa [#allocation3], 1 }
  0xc1   :  { %450 = vsyncpa [#allocation4], 1 }
  0xc2   :  { %451 = vsyncpa [#allocation5], 1 }

</bundles_post_ra>
